<compile_context>
chip_gen: v6e
topology: v6e:2x2x1
jax: 0.10.0
libtpu: 0.0.40
codegen_flags: <defaults>
</compile_context>

<pallas_src>
import math

import jax
import jax.numpy as jnp
from jax.experimental import pallas as pl
from jax.experimental.pallas import tpu as pltpu

LANE = 128


def _round_up(v, m):
    return (v + m - 1) // m * m


def mlp_kernel(x_ref, w1_ref, b1_ref, w2_ref, b2_ref, w3_ref, b3_ref, o_ref):
    # Use full-precision MXU passes only when the compute dtype is f32 (free here);
    # bf16 inputs are already a single native MXU pass.
    prec = (jax.lax.Precision.HIGHEST if w1_ref.dtype == jnp.float32
            else jax.lax.Precision.DEFAULT)

    x = x_ref[...].astype(w1_ref.dtype)                   # (tile_m, D), batch-major

    # fc1: h1 = W1 @ x^T as an NT contraction (last dim of both operands) -> (H1, tile_m)
    # feature-major, f32 accumulation. No explicit transpose/relayout of the x tile.
    h1 = jax.lax.dot_general(
        w1_ref[...], x, (((1,), (1,)), ((), ())),
        precision=prec, preferred_element_type=jnp.float32)
    h1 = jnp.maximum(h1 + b1_ref[...], 0.0)                # bias + ReLU in f32
    # TODO(synk): training-mode dropout (p=0.1) not applied; inference semantics used.

    # fc2 + ReLU  -> (H2, tile_m)
    h2 = jnp.dot(w2_ref[...], h1.astype(w2_ref.dtype),
                 precision=prec, preferred_element_type=jnp.float32)
    h2 = jnp.maximum(h2 + b2_ref[...], 0.0)

    # fc3 (single logit): VPU multiply + sublane reduce -> lane-dense (1, tile_m) row.
    out = jnp.sum(h2 * w3_ref[...], axis=0, keepdims=True) + b3_ref[...]
    o_ref[...] = out.astype(o_ref.dtype)


def _auto_tile_m(B, D, x_itemsize, H1, H2, *, budget_bytes=16 << 20, cap=16384):
    """Pick the batch-tile size (rows per grid step, multiple of 128).

    VMEM per row (feature-major intermediates -> no lane padding):
      double-buffered x tile + f32 h1 (plus one temp) + f32 h2 + double-buffered out row.
    The 16 MiB budget leaves 2x headroom under the explicit 32 MiB vmem limit (safe on
    v5e/v6e/v7x alike); the absolute cap of 16384 rows keeps per-step DMA >> per-step
    overhead on all generations.
    """
    per_row = 2 * D * x_itemsize + 4 * (2 * H1 + _round_up(H2, 8) + 2 * 8)
    tile_m = max(LANE, min(cap, budget_bytes // per_row) // LANE * LANE)
    tile_m = min(tile_m, _round_up(B, LANE))
    steps = pl.cdiv(B, tile_m)
    if steps > 1 and steps % 2 == 1:
        # Prefer an even number of grid steps so both v7x TensorCores get equal work
        # (no effect on single-TC v5e/v6e beyond a slightly smaller tile).
        tile_m = max(LANE, _round_up(pl.cdiv(B, steps + 1), LANE))
    return tile_m


def mlp_classifier(x, params, *, tile_m=None, compute_dtype=jnp.bfloat16,
                   vmem_limit_bytes=32 * 1024 * 1024):
    """x: (*, input_dim) -> (*, 1) float32 logits (inference forward pass).

    Params are PyTorch-layout: w (out, in), b (out,). Feeding x in bfloat16 halves the
    HBM traffic of this bandwidth-bound kernel; f32 x also works (cast in VMEM).
    """
    w1, b1, w2, b2, w3, b3 = params
    H1, D = w1.shape
    H2 = w2.shape[0]

    lead = x.shape[:-1]
    x2 = x.reshape(-1, D)                       # free reshape of leading dims
    B = x2.shape[0]

    if tile_m is None:
        tile_m = _auto_tile_m(B, D, jnp.dtype(x2.dtype).itemsize, H1, H2)
    assert tile_m % LANE == 0, "tile_m must be a multiple of 128 (lane width)"

    # Tiny one-time parameter casts / re-layouts (weights are only KBs).
    w1c = w1.astype(compute_dtype)
    w2c = w2.astype(compute_dtype)
    b1c = b1.reshape(H1, 1).astype(jnp.float32)
    b2c = b2.reshape(H2, 1).astype(jnp.float32)
    w3c = w3.reshape(H2, 1).astype(jnp.float32)   # fc3.weight (1, H2) -> column
    b3c = b3.reshape(1, 1).astype(jnp.float32)

    grid = (pl.cdiv(B, tile_m),)                  # ragged last tile handled by Pallas

    out_row = pl.pallas_call(
        mlp_kernel,
        out_shape=jax.ShapeDtypeStruct((1, B), jnp.float32),
        grid_spec=pltpu.PrefetchScalarGridSpec(
            num_scalar_prefetch=0,
            grid=grid,
            in_specs=[
                # x: contiguous batch-major tiles (one DMA per step)
                pl.BlockSpec((tile_m, D), lambda i: (i, 0)),
                # weights / biases: full arrays, constant index_map -> VMEM-resident
                pl.BlockSpec((H1, D), lambda i: (0, 0)),
                pl.BlockSpec((H1, 1), lambda i: (0, 0)),
                pl.BlockSpec((H2, H1), lambda i: (0, 0)),
                pl.BlockSpec((H2, 1), lambda i: (0, 0)),
                pl.BlockSpec((H2, 1), lambda i: (0, 0)),
                pl.BlockSpec((1, 1), lambda i: (0, 0)),
            ],
            # lane-dense output row per step; OOB lanes of the ragged tile are masked
            out_specs=pl.BlockSpec((1, tile_m), lambda i: (0, i)),
        ),
        compiler_params=pltpu.CompilerParams(
            dimension_semantics=("parallel",),
            vmem_limit_bytes=vmem_limit_bytes,
        ),
    )(x2, w1c, b1c, w2c, b2c, w3c, b3c)

    return out_row.reshape(*lead, 1)


def init_params(key, input_dim):
    """nn.Linear-style init: uniform(-1/sqrt(fan_in), 1/sqrt(fan_in)); torch layouts."""
    dims = [(80, input_dim), (10, 80), (1, 10)]
    params = []
    for fan_out, fan_in in dims:
        key, kw, kb = jax.random.split(key, 3)
        bound = 1.0 / math.sqrt(fan_in)
        params.append(jax.random.uniform(kw, (fan_out, fan_in), jnp.float32, -bound, bound))
        params.append(jax.random.uniform(kb, (fan_out,), jnp.float32, -bound, bound))
    return tuple(params)


def mlp_reference(x, params, compute_dtype=jnp.bfloat16):
    """Pure-JAX reference mirroring the kernel numerics: compute_dtype matmul inputs,
    exact (f32) products/accumulation, f32 bias + ReLU, f32 head."""
    w1, b1, w2, b2, w3, b3 = params
    hi = jax.lax.Precision.HIGHEST
    f32 = jnp.float32
    xq = x.astype(compute_dtype).astype(f32)
    w1q = w1.astype(compute_dtype).astype(f32)
    w2q = w2.astype(compute_dtype).astype(f32)
    h1 = jnp.maximum(jnp.dot(xq, w1q.T, precision=hi) + b1.astype(f32), 0.0)
    h1 = h1.astype(compute_dtype).astype(f32)
    h2 = jnp.maximum(jnp.dot(h1, w2q.T, precision=hi) + b2.astype(f32), 0.0)
    return jnp.dot(h2, w3.astype(f32).T, precision=hi) + b3.astype(f32)


if __name__ == "__main__":
    key = jax.random.PRNGKey(0)
    key, kx = jax.random.split(key)

    batch, input_dim = 250, 32   # non-multiple-of-128 batch exercises the ragged last tile
    x = jax.random.normal(kx, (batch, input_dim), jnp.float32).astype(jnp.bfloat16)
    params = init_params(key, input_dim)

    out = jax.block_until_ready(mlp_classifier(x, params))

    ref = mlp_reference(x, params)
    assert out.shape == (batch, 1), out.shape
    max_err = float(jnp.max(jnp.abs(out - ref)))
    assert jnp.allclose(out, ref, atol=1e-3, rtol=1e-3), max_err

    print("KERNEL_OK")
</pallas_src>

<mosaic_0001>
module attributes {stable_mosaic.version = 11 : i64} {
  func.func @mlp_kernel(%arg0: i32, %arg1: memref<256x32xbf16, #tpu.memory_space<vmem>>, %arg2: memref<80x32xbf16, #tpu.memory_space<vmem>>, %arg3: memref<80x1xf32, #tpu.memory_space<vmem>>, %arg4: memref<10x80xbf16, #tpu.memory_space<vmem>>, %arg5: memref<10x1xf32, #tpu.memory_space<vmem>>, %arg6: memref<10x1xf32, #tpu.memory_space<vmem>>, %arg7: memref<1x1xf32, #tpu.memory_space<vmem>>, %arg8: memref<1x256xf32, #tpu.memory_space<vmem>>) attributes {dimension_semantics = [#tpu.dimension_semantics<parallel>], iteration_bounds = array<i64: 1>, scalar_prefetch = 0 : i64, scratch_operands = 0 : i64, tpu.core_type = #tpu.core_type<tc>, window_params = [{transform_indices = @transform_0, window_bounds = array<i64: 256, 32>}, {pipeline_mode = #tpu.pipeline_mode<synchronous>, transform_indices = @transform_1, window_bounds = array<i64: 80, 32>}, {pipeline_mode = #tpu.pipeline_mode<synchronous>, transform_indices = @transform_2, window_bounds = array<i64: 80, 1>}, {pipeline_mode = #tpu.pipeline_mode<synchronous>, transform_indices = @transform_3, window_bounds = array<i64: 10, 80>}, {pipeline_mode = #tpu.pipeline_mode<synchronous>, transform_indices = @transform_4, window_bounds = array<i64: 10, 1>}, {pipeline_mode = #tpu.pipeline_mode<synchronous>, transform_indices = @transform_5, window_bounds = array<i64: 10, 1>}, {pipeline_mode = #tpu.pipeline_mode<synchronous>, transform_indices = @transform_6, window_bounds = array<i64: 1, 1>}, {transform_indices = @transform_7, window_bounds = array<i64: 1, 256>}]} {
    %c0 = arith.constant 0 : index
    %c0_0 = arith.constant 0 : index
    %0 = vector.load %arg1[%c0, %c0_0] : memref<256x32xbf16, #tpu.memory_space<vmem>>, vector<256x32xbf16>
    %c0_1 = arith.constant 0 : index
    %c0_2 = arith.constant 0 : index
    %1 = vector.load %arg2[%c0_1, %c0_2] : memref<80x32xbf16, #tpu.memory_space<vmem>>, vector<80x32xbf16>
    %cst = arith.constant dense<0.000000e+00> : vector<80x256xf32>
    %2 = tpu.matmul %1, %0, %cst {dimension_numbers = #tpu.dot_dimension_numbers<[1], [1], [0], [0], [0, 0, 1, 0], [], []>} : vector<80x32xbf16>, vector<256x32xbf16>, vector<80x256xf32> -> vector<80x256xf32>
    %c0_3 = arith.constant 0 : index
    %c0_4 = arith.constant 0 : index
    %3 = vector.load %arg3[%c0_3, %c0_4] : memref<80x1xf32, #tpu.memory_space<vmem>>, vector<80x1xf32>
    %4 = vector.broadcast %3 : vector<80x1xf32> to vector<80x256xf32>
    %5 = arith.addf %2, %4 : vector<80x256xf32>
    %cst_5 = arith.constant 0.000000e+00 : f32
    %6 = vector.broadcast %cst_5 : f32 to vector<80x256xf32>
    %7 = arith.maximumf %5, %6 : vector<80x256xf32>
    %c0_6 = arith.constant 0 : index
    %c0_7 = arith.constant 0 : index
    %8 = vector.load %arg4[%c0_6, %c0_7] : memref<10x80xbf16, #tpu.memory_space<vmem>>, vector<10x80xbf16>
    %9 = arith.truncf %7 : vector<80x256xf32> to vector<80x256xbf16>
    %cst_8 = arith.constant dense<0.000000e+00> : vector<10x256xf32>
    %10 = tpu.matmul %8, %9, %cst_8 {dimension_numbers = #tpu.dot_dimension_numbers<[1], [0], [0], [1], [0, 0, 1, 1], [], []>} : vector<10x80xbf16>, vector<80x256xbf16>, vector<10x256xf32> -> vector<10x256xf32>
    %c0_9 = arith.constant 0 : index
    %c0_10 = arith.constant 0 : index
    %11 = vector.load %arg5[%c0_9, %c0_10] : memref<10x1xf32, #tpu.memory_space<vmem>>, vector<10x1xf32>
    %12 = vector.broadcast %11 : vector<10x1xf32> to vector<10x256xf32>
    %13 = arith.addf %10, %12 : vector<10x256xf32>
    %cst_11 = arith.constant 0.000000e+00 : f32
    %14 = vector.broadcast %cst_11 : f32 to vector<10x256xf32>
    %15 = arith.maximumf %13, %14 : vector<10x256xf32>
    %c0_12 = arith.constant 0 : index
    %c0_13 = arith.constant 0 : index
    %16 = vector.load %arg6[%c0_12, %c0_13] : memref<10x1xf32, #tpu.memory_space<vmem>>, vector<10x1xf32>
    %17 = vector.broadcast %16 : vector<10x1xf32> to vector<10x256xf32>
    %18 = arith.mulf %15, %17 : vector<10x256xf32>
    %cst_14 = arith.constant dense<0.000000e+00> : vector<256xf32>
    %19 = vector.multi_reduction <add>, %18, %cst_14 [0] : vector<10x256xf32> to vector<256xf32>
    %20 = vector.shape_cast %19 : vector<256xf32> to vector<1x256xf32>
    %c0_15 = arith.constant 0 : index
    %c0_16 = arith.constant 0 : index
    %21 = vector.load %arg7[%c0_15, %c0_16] : memref<1x1xf32, #tpu.memory_space<vmem>>, vector<1x1xf32>
    %22 = vector.broadcast %21 : vector<1x1xf32> to vector<1x256xf32>
    %23 = arith.addf %20, %22 : vector<1x256xf32>
    %c0_17 = arith.constant 0 : index
    %c0_18 = arith.constant 0 : index
    %24 = vector.load %arg8[%c0_17, %c0_18] : memref<1x256xf32, #tpu.memory_space<vmem>>, vector<1x256xf32>
    tpu.vector_store %arg8[%c0_17, %c0_18], %23 {strides = array<i32>} : memref<1x256xf32, #tpu.memory_space<vmem>>, vector<1x256xf32>,
    return
  }
  func.func @transform_0(%arg0: i32) -> (i32, i32) {
    %c0_i32 = arith.constant 0 : i32
    %c0_i32_0 = arith.constant 0 : i32
    return %arg0, %c0_i32 : i32, i32
  }
  func.func @transform_1(%arg0: i32) -> (i32, i32) {
    %c0_i32 = arith.constant 0 : i32
    %c0_i32_0 = arith.constant 0 : i32
    %c0_i32_1 = arith.constant 0 : i32
    return %c0_i32, %c0_i32_0 : i32, i32
  }
  func.func @transform_2(%arg0: i32) -> (i32, i32) {
    %c0_i32 = arith.constant 0 : i32
    %c0_i32_0 = arith.constant 0 : i32
    %c0_i32_1 = arith.constant 0 : i32
    return %c0_i32, %c0_i32_0 : i32, i32
  }
  func.func @transform_3(%arg0: i32) -> (i32, i32) {
    %c0_i32 = arith.constant 0 : i32
    %c0_i32_0 = arith.constant 0 : i32
    %c0_i32_1 = arith.constant 0 : i32
    return %c0_i32, %c0_i32_0 : i32, i32
  }
  func.func @transform_4(%arg0: i32) -> (i32, i32) {
    %c0_i32 = arith.constant 0 : i32
    %c0_i32_0 = arith.constant 0 : i32
    %c0_i32_1 = arith.constant 0 : i32
    return %c0_i32, %c0_i32_0 : i32, i32
  }
  func.func @transform_5(%arg0: i32) -> (i32, i32) {
    %c0_i32 = arith.constant 0 : i32
    %c0_i32_0 = arith.constant 0 : i32
    %c0_i32_1 = arith.constant 0 : i32
    return %c0_i32, %c0_i32_0 : i32, i32
  }
  func.func @transform_6(%arg0: i32) -> (i32, i32) {
    %c0_i32 = arith.constant 0 : i32
    %c0_i32_0 = arith.constant 0 : i32
    %c0_i32_1 = arith.constant 0 : i32
    return %c0_i32, %c0_i32_0 : i32, i32
  }
  func.func @transform_7(%arg0: i32) -> (i32, i32) {
    %c0_i32 = arith.constant 0 : i32
    %c0_i32_0 = arith.constant 0 : i32
    return %c0_i32, %arg0 : i32, i32
  }
}

</mosaic_0001>

<bundles_post_ra>
// kernel: tpu_custom_call.1
= control target key start
LH: loop header
LB: loop body
LE: loop exit
PB: predicated region body
PF: predicated region fallthrough
CT: control target
= control target key end

     0   :  { %s869_s0 = inlined_call_operand.vmem [shape: bf16[250,32], index: 0, kind: input, shape index: {}]   ;;  %s870_s1 = inlined_call_operand.vmem [shape: bf16[80,32], index: 1, kind: input, shape index: {}]   ;;  %s871_s2 = inlined_call_operand.vmem [shape: f32[80,1], index: 2, kind: input, shape index: {}]   ;;  %s872_s3 = inlined_call_operand.vmem [shape: bf16[10,80], index: 3, kind: input, shape index: {}]   ;;  %s873_s4 = inlined_call_operand.vmem [shape: f32[10,1], index: 4, kind: input, shape index: {}]   ;;  %s874_s5 = inlined_call_operand.vmem [shape: f32[10,1], index: 5, kind: input, shape index: {}]   ;;  %s875_s6 = inlined_call_operand.<no memory space> [shape: f32[1,1], index: 6, kind: input, shape index: {}]   ;;  %s876_s7 = inlined_call_operand.hbm [shape: f32[1,250], index: 7, kind: output, shape index: {}]  }
   0x1   :  { %v12_v0 = vstv %s875_s6 }
   0x2   :  { %13 = vst [vmem:[#allocation2] sm:$0x1] %v12_v0 }
   0x3   :  { %v633_v1 = vld [vmem:[%s869_s0 + $0x78] sm:$0xff]   ;;  %vm237_vm0 = vcmask 261120   ;;  %v635_v3 = vld [vmem:[%s869_s0 + $0x70] sm:$0xff]   ;;  %v677_v4 = vmov 0   ;;  %v637_v8 = vld [vmem:[%s869_s0 + $0x68] sm:$0xff]  }
   0x4   :  { %v634_v2 = vld [vmem:[%s869_s0 + $0x38] sm:$0xff]   ;;  %620 = vmatprep.subr.msk.bf16.mxu0 %vm237_vm0, %v633_v1  ;;  %631 = vset.pattern.permute.xlu0 %v677_v4  ;;  %v636_v6 = vld [vmem:[%s869_s0 + $0x30] sm:$0xff]   ;;  %v638_v9 = vld [vmem:[%s869_s0 + $0x28] sm:$0xff]  }
   0x5   :  { %v275_v5 = vsel %vm237_vm0, %v634_v2, 0  ;;  %632 = vset.pattern.permute.xlu1 %v677_v4  ;;  %469 = vmatprep.mubr.bf16.mxu1 %v677_v4  ;;  %v272_v7 = vsel %vm237_vm0, %v636_v6, 0  ;;  %v649_v10 = vld [vmem:[%s870_s1] sm:$0xff]   ;;  %v269_v11 = vsel %vm237_vm0, %v638_v9, 0  ;;  %v78_v15 = vld [vmem:[%s871_s2 + $0x30] sm:$0xff]  ;;  %v81_v16 = vld [vmem:[%s871_s2 + $0x48] sm:$0xff] }
   0x6   :  { %595 = vmatpush3.bf16.xpose.msra.mxu0 %v275_v5  ;;  %v639_v12 = vld [vmem:[%s869_s0 + $0x60] sm:$0xff]   ;;  %610 = vmatprep.mubr.msk.bf16.mxu0 %vm237_vm0, %v649_v10  ;;  %v79_v17 = vld [vmem:[%s871_s2 + $0x38] sm:$0xff] }
   0x7   :  { %621 = vmatprep.subr.msk.bf16.mxu0 %vm237_vm0, %v635_v3  ;;  %v640_v13 = vld [vmem:[%s869_s0 + $0x20] sm:$0xff]   ;;  %114 = vperm.xlu1 %632, %v78_v15   ;;  %v641_v19 = vld [vmem:[%s869_s0 + $0x58] sm:$0xff]  }
   0x8   :  { %v80_v14 = vld [vmem:[%s871_s2 + $0x40] sm:$0xff]  ;;  %v266_v18 = vsel %vm237_vm0, %v640_v13, 0 }
   0x9   :  { %124 = vperm.xlu0 %631, %v80_v14  }
   0xb   :  { %119 = vperm.xlu1 %632, %v79_v17  }
   0xd   :  { %129 = vperm.xlu0 %631, %v81_v16  }
   0xe   :  { %597 = vmatpush3.bf16.xpose.msra.mxu0 %v272_v7 }
   0xf   :  { %622 = vmatprep.subr.msk.bf16.mxu0 %vm237_vm0, %v637_v8 }
  0x16   :  { %599 = vmatpush3.bf16.xpose.msra.mxu0 %v269_v11 }
  0x17   :  { %623 = vmatprep.subr.msk.bf16.mxu0 %vm237_vm0, %v639_v12 }
  0x18   :  { %14 = vsyncpa [#allocation4], 0  ;;  %v76_v20 = vld [vmem:[%s871_s2 + $0x20] sm:$0xff]  ;;  %v77_v21 = vld [vmem:[%s871_s2 + $0x28] sm:$0xff]  ;;  %vm433_vm1 = vcmask 654336   ;;  %vm500_vm2 = vcmask 1041408  }
  0x19   :  { %v642_v22 = vld [vmem:[%s869_s0 + $0x18] sm:$0xff]   ;;  %104 = vperm.xlu0 %631, %v76_v20   ;;  %109 = vperm.xlu1 %632, %v77_v21   ;;  %v74_v23 = vld [vmem:[%s871_s2 + $0x10] sm:$0xff]  ;;  %v72_v27 = vld [vmem:[%s871_s2] sm:$0xff] }
  0x1a   :  { %v75_v24 = vld [vmem:[%s871_s2 + $0x18] sm:$0xff]  ;;  %v263_v25 = vsel %vm237_vm0, %v642_v22, 0  ;;  %v643_v26 = vld [vmem:[%s869_s0 + $0x50] sm:$0xff]   ;;  %v73_v28 = vld [vmem:[%s871_s2 + $0x8] sm:$0xff] }
  0x1b   :  { %v644_v29 = vld [vmem:[%s869_s0 + $0x10] sm:$0xff]   ;;  %v417_v30 = vld [vmem:[%s873_s4 + $0x8] sm:$0x3]  ;;  %v416_v31 = vld [vmem:[%s873_s4] sm:$0xff] }
  0x1c   :  { %v260_v32 = vsel %vm237_vm0, %v644_v29, 0  ;;  %v645_v33 = vld [vmem:[%s869_s0 + $0x48] sm:$0xff]   ;;  %v484_v35 = vld [vmem:[%s874_s5] sm:$0xff]  ;;  %v651_v43 = vld [vmem:[%s870_s1 + $0x10] sm:$0xff]  }
  0x1d   :  { %94 = vperm.xlu0 %631, %v74_v23   ;;  %99 = vperm.xlu1 %632, %v75_v24   ;;  %v485_v34 = vld [vmem:[%s874_s5 + $0x8] sm:$0x3]  ;;  %v517_v37 = vld [vmem:[#allocation2] sm:$0x1]  ;;  %v652_v44 = vld [vmem:[%s870_s1 + $0x18] sm:$0xff]  }
  0x1e   :  { %601 = vmatpush3.bf16.xpose.msra.mxu0 %v266_v18  ;;  %v646_v36 = vld [vmem:[%s869_s0 + $0x8] sm:$0xff]   ;;  %v647_v39 = vld [vmem:[%s869_s0 + $0x40] sm:$0xff]  }
  0x1f   :  { %624 = vmatprep.subr.msk.bf16.mxu0 %vm237_vm0, %v641_v19  ;;  %v257_v38 = vsel %vm237_vm0, %v646_v36, 0  ;;  %v648_v40 = vld [vmem:[%s869_s0] sm:$0xff]   ;;  %v650_v42 = vld [vmem:[%s870_s1 + $0x8] sm:$0xff]  }
  0x20   :  { %v254_v41 = vsel %vm237_vm0, %v648_v40, 0  ;;  %v653_v45 = vld [vmem:[%s870_s1 + $0x20] sm:$0xff]  }
  0x21   :  { %84 = vperm.xlu0 %631, %v72_v27   ;;  %89 = vperm.xlu1 %632, %v73_v28  }
  0x25   :  { %425 = vperm.xlu0 %631, %v417_v30   ;;  %420 = vperm.xlu1 %632, %v416_v31  }
  0x26   :  { %603 = vmatpush3.bf16.xpose.msra.mxu0 %v263_v25 }
  0x27   :  { %625 = vmatprep.subr.msk.bf16.mxu0 %vm237_vm0, %v643_v26 }
  0x29   :  { %493 = vperm.xlu0 %631, %v485_v34   ;;  %488 = vperm.xlu1 %632, %v484_v35  }
  0x2d   :  { %520 = vperm.xlu0 %631, %v517_v37  }
  0x2e   :  { %605 = vmatpush3.bf16.xpose.msra.mxu0 %v260_v32 }
  0x2f   :  { %626 = vmatprep.subr.msk.bf16.mxu0 %vm237_vm0, %v645_v33 }
  0x36   :  { %607 = vmatpush3.bf16.xpose.msra.mxu0 %v257_v38 }
  0x37   :  { %627 = vmatprep.subr.msk.bf16.mxu0 %vm237_vm0, %v647_v39 }
  0x3e   :  { %609 = vmatpush3.bf16.xpose.msra.mxu0 %v254_v41 }
  0x45   :  { %611 = vmatmul.mubr.msk.bf16.vlgmr.msra.gmra.mxu0 %vm237_vm0, %v649_v10 }
  0x46   :  { %612 = vmatprep.mubr.msk.bf16.mxu0 %vm237_vm0, %v650_v42 }
  0x4d   :  { %613 = vmatmul.mubr.msk.bf16.gmra.mxu0 %vm237_vm0, %v650_v42 }
  0x4e   :  { %614 = vmatprep.mubr.msk.bf16.mxu0 %vm237_vm0, %v651_v43 }
  0x55   :  { %615 = vmatmul.mubr.msk.bf16.gmra.mxu0 %vm237_vm0, %v651_v43 }
  0x56   :  { %616 = vmatprep.mubr.msk.bf16.mxu0 %vm237_vm0, %v652_v44 }
  0x5d   :  { %617 = vmatmul.mubr.msk.bf16.gmra.mxu0 %vm237_vm0, %v652_v44 }
  0x5e   :  { %618 = vmatprep.mubr.msk.bf16.mxu0 %vm237_vm0, %v653_v45 }
  0x65   :  { %619 = vmatmul.mubr.msk.bf16.gmra.mxu0 %vm237_vm0, %v653_v45 }
  0x82   :  { %v115_v58 = vpop.permute.xlu1 %114 }
  0x84   :  { %v125_v60 = vpop.permute.xlu0 %124 }
  0x86   :  { %v120_v63 = vpop.permute.xlu1 %119 }
  0x88   :  { %v130_v1 = vpop.permute.xlu0 %129 }
  0x94   :  { %v110_v4 = vpop.permute.xlu1 %109  ;;  %v105_v9 = vpop.permute.xlu0 %104 }
  0x98   :  { %v100_v20 = vpop.permute.xlu1 %99  ;;  %v95_v26 = vpop.permute.xlu0 %94 }
  0x9c   :  { %v90_v37 = vpop.permute.xlu1 %89  ;;  %v85_v44 = vpop.permute.xlu0 %84 }
 0x105   :  { %v854_v46 = vpop.f32.mrf.mxu0 }
 0x107   :  { %v856_v47 = vpop.f32.mrf.mxu0 }
 0x109   :  { %v858_v48 = vpop.f32.mrf.mxu0 }
 0x10b   :  { %v341_v49 = vpop.f32.mrf.mxu0 }
 0x10c   :  { %v342_v41 = vadd.f32 %v341_v49, %v90_v37 }
 0x10d   :  { %v345_v50 = vpop.f32.mrf.mxu0 }
 0x10e   :  { %v346_v45 = vadd.f32 %v345_v50, %v95_v26 }
 0x10f   :  { %v347_v51 = vpop.f32.mrf.mxu0 }
 0x110   :  { %v348_v35 = vadd.f32 %v347_v51, %v95_v26 }
 0x111   :  { %v349_v52 = vpop.f32.mrf.mxu0 }
 0x112   :  { %v350_v38 = vadd.f32 %v349_v52, %v100_v20  ;;  %v336_v52 = vadd.f32 %v854_v46, %v85_v44  ;;  %v421_v46 = vpop.permute.xlu1 %420 }
 0x113   :  { %v351_v53 = vpop.f32.mrf.mxu0 }
 0x114   :  { %v352_v30 = vadd.f32 %v351_v53, %v100_v20  ;;  %v338_v53 = vadd.f32 %v856_v47, %v85_v44  ;;  %v390_v51 = vmax.f32 %v350_v38, 0.0 }
 0x115   :  { %v355_v54 = vpop.f32.mrf.mxu0 }
 0x116   :  { %v356_v33 = vadd.f32 %v355_v54, %v105_v9  ;;  %v391_v42 = vmax.f32 %v352_v30, 0.0  ;;  %v340_v54 = vadd.f32 %v858_v48, %v90_v37  ;;  %v385_v49 = vmax.f32 %v338_v53, 0.0  ;;  %v654_v48 = vld [vmem:[%s872_s3] sm:$0x1f]   ;;  %s679_s3 = smov [#allocation3]  }
 0x117   :  { %v357_v55 = vpop.f32.mrf.mxu0  ;;  %s558_s21 = sshll.u32 %s679_s3, 4  ;;  %s559_s21 = int_to_ptr.vmem [resolvable:$true] %s558_s21 }
 0x118   :  { %v358_v23 = vadd.f32 %v357_v55, %v105_v9  ;;  %v392_v55 = vmax.f32 %v356_v33, 0.0  ;;  %s655_s22 = scalar_lea.vmem %s559_s21, 32  ;;  %p660_p1 = scmp.lt.s32.totalorder %s559_s21, %s559_s21 }
 0x119   :  { %v359_v56 = vpop.f32.mrf.mxu0  ;;  %p656_p0 = scmp.ne.s32.totalorder %s559_s21, %s655_s22  ;;  %p661_p2 = scmp.lt.s32.totalorder %s655_s22, %s655_s22 }
 0x11a   :  { %v360_v27 = vadd.f32 %v359_v56, %v110_v4  ;;  %v393_v36 = vmax.f32 %v358_v23, 0.0  ;;  %v389_v56 = vmax.f32 %v348_v35, 0.0 }
 0x11b   :  { %v361_v57 = vpop.f32.mrf.mxu0  ;;  %p662_p3 = por %p661_p2, %p660_p1 }
 0x11c   :  { %v362_v16 = vadd.f32 %v361_v57, %v110_v4  ;;  %v394_v39 = vmax.f32 %v360_v27, 0.0 }
 0x11d   :  { %v365_v59 = vpop.f32.mrf.mxu0  ;;  %p663_p4 = pnand %p662_p3, %p656_p0 }
 0x11e   :  { %v366_v21 = vadd.f32 %v365_v59, %v115_v58  ;;  %v395_v31 = vmax.f32 %v362_v16, 0.0  ;;  %v410_v57 = vpack.c.bf16 %v394_v39, %v392_v55  ;;  %v409_v59 = vpack.c.bf16 %v391_v42, %v389_v56 }
 0x11f   :  { %v367_v61 = vpop.f32.mrf.mxu0 }
 0x120   :  { %v368_v12 = vadd.f32 %v367_v61, %v115_v58  ;;  %v396_v34 = vmax.f32 %v366_v21, 0.0  ;;  %v411_v43 = vpack.c.bf16 %v395_v31, %v393_v36  ;;  %v387_v58 = vmax.f32 %v342_v41, 0.0 }
 0x121   :  { %v369_v62 = vpop.f32.mrf.mxu0  ;;  %v386_v61 = vmax.f32 %v340_v54, 0.0 }
 0x122   :  { %v370_v14 = vadd.f32 %v369_v62, %v120_v63  ;;  %v397_v24 = vmax.f32 %v368_v12, 0.0  ;;  %v407_v62 = vpack.c.bf16 %v387_v58, %v385_v49 }
 0x123   :  { %v371_v0 = vpop.f32.mrf.mxu0 }
 0x124   :  { %v372_v6 = vadd.f32 %v371_v0, %v120_v63  ;;  %v398_v28 = vmax.f32 %v370_v14, 0.0  ;;  %v384_v63 = vmax.f32 %v336_v52, 0.0 }
 0x125   :  { %v375_v2 = vpop.f32.mrf.mxu0 }
 0x126   :  { %v376_v10 = vadd.f32 %v375_v2, %v125_v60  ;;  %v399_v17 = vmax.f32 %v372_v6, 0.0  ;;  %v412_v40 = vpack.c.bf16 %v398_v28, %v396_v34  ;;  %v406_v47 = vpack.c.bf16 %v386_v61, %v384_v63 }
 0x127   :  { %v377_v3 = vpop.f32.mrf.mxu0 }
 0x128   :  { %v378_v7 = vadd.f32 %v377_v3, %v125_v60  ;;  %v400_v22 = vmax.f32 %v376_v10, 0.0  ;;  %v413_v32 = vpack.c.bf16 %v399_v17, %v397_v24  ;;  %v388_v60 = vmax.f32 %v346_v45, 0.0 }
 0x129   :  { %v379_v5 = vpop.f32.mrf.mxu0 }
 0x12a   :  { %v380_v8 = vadd.f32 %v379_v5, %v130_v1  ;;  %v401_v18 = vmax.f32 %v378_v7, 0.0  ;;  %v408_v50 = vpack.c.bf16 %v390_v51, %v388_v60 }
 0x12b   :  { %v381_v11 = vpop.f32.mrf.mxu0 }
 0x12c   :  { %v382_v13 = vadd.f32 %v381_v11, %v130_v1  ;;  %v402_v15 = vmax.f32 %v380_v8, 0.0  ;;  %v426_v1 = vpop.permute.xlu0 %425 }
 0x12e   :  { %v403_v19 = vmax.f32 %v382_v13, 0.0  ;;  %v414_v29 = vpack.c.bf16 %v402_v15, %v400_v22  ;;  %v489_v13 = vpop.permute.xlu1 %488  ;;  %v523_v22 = vlaneseq }
 0x130   :  { %v415_v25 = vpack.c.bf16 %v403_v19, %v401_v18  ;;  %v494_v11 = vpop.permute.xlu0 %493  ;;  %v524_v27 = vshrl.u32 %v523_v22, 7  ;;  %vm549_vm3 = vcmp.lt.s32.totalorder %v523_v22, 256 }
 0x132   :  { %443 = vmatprep.subr.bf16.mxu1 %v415_v25  ;;  %v525_v34 = vsub.s32 0, %v524_v27 }
 0x133   :  { %444 = vmatpush1.bf16.msra.mxu1 %v414_v29 }
 0x134   :  { %445 = vmatprep.subr.bf16.mxu1 %v413_v32  ;;  %v678_v32 = vmov 1966171168   ;;  %v521_v37 = vpop.permute.xlu0 %520 }
 0x135   :  { %v533_v33 = vunpack.c.l.s4 %v678_v32  ;;  %v526_v41 = vrot.slane %v521_v37, %v525_v34 }
 0x137   :  { %446 = vmatpush1.bf16.msra.mxu1 %v412_v40  ;;  %v534_v40 = vunpack.c.0.s8 %v533_v33 }
 0x138   :  { %447 = vmatprep.subr.bf16.mxu1 %v411_v43 }
 0x139   :  { %v537_v45 = vsub.s32 %v534_v40, %v524_v27 }
 0x13b   :  { %448 = vmatpush1.bf16.msra.mxu1 %v410_v57 }
 0x13c   :  { %449 = vmatprep.subr.bf16.mxu1 %v409_v59 }
 0x13f   :  { %450 = vmatpush1.bf16.msra.mxu1 %v408_v50 }
 0x140   :  { %451 = vmatprep.subr.bf16.mxu1 %v407_v62 }
 0x143   :  { %452 = vmatpush1.bf16.msra.mxu1 %v406_v47 }
 0x146   :  { %593 = vmatmul.mubr.msk.bf16.vlgmr.msra.gmra.mxu1 %vm433_vm1, %v654_v48 }
 0x206   :  { %v471_v0 = vpop.f32.mrf.mxu1 }
 0x207   :  { %v472_v2 = vadd.f32 %v471_v0, %v421_v46 }
 0x208   :  { %v473_v3 = vpop.f32.mrf.mxu1 }
 0x209   :  { %v474_v4 = vadd.f32 %v473_v3, %v421_v46  ;;  %v480_v7 = vmax.f32 %v472_v2, 0.0 }
 0x20a   :  { %v475_v5 = vpop.f32.mrf.mxu1 }
 0x20b   :  { %v476_v6 = vadd.f32 %v475_v5, %v426_v1  ;;  %v481_v12 = vmax.f32 %v474_v4, 0.0  ;;  %v496_v16 = vmul.f32 %v489_v13, %v480_v7 }
 0x20c   :  { %v477_v8 = vpop.f32.mrf.mxu1 }
 0x20d   :  { %v482_v9 = vmax.f32 %v476_v6, 0.0  ;;  %v478_v10 = vadd.f32 %v477_v8, %v426_v1  ;;  %v497_v19 = vmul.f32 %v489_v13, %v481_v12 }
 0x20f   :  { %v498_v14 = vmul.f32 %v494_v11, %v482_v9  ;;  %v483_v15 = vmax.f32 %v478_v10, 0.0 }
 0x211   :  { %v501_v17 = vsel %vm500_vm2, %v498_v14, 0.0  ;;  %v499_v18 = vmul.f32 %v494_v11, %v483_v15 }
 0x212   :  { %v502_v20 = vadd.f32 %v501_v17, %v496_v16 }
 0x213   :  { %v509_v21 = vsel %vm500_vm2, %v499_v18, 0.0 }
 0x214   :  { %v503_v23 = vrot.slane %v502_v20, 4  ;;  %v510_v24 = vadd.f32 %v509_v21, %v497_v19 }
 0x216   :  { %v504_v25 = vadd.f32 %v503_v23, %v502_v20  ;;  %v511_v26 = vrot.slane %v510_v24, 4 }
 0x218   :  { %v505_v28 = vrot.slane %v504_v25, 2  ;;  %v512_v29 = vadd.f32 %v511_v26, %v510_v24 }
 0x21a   :  { %v506_v30 = vadd.f32 %v505_v28, %v504_v25  ;;  %v513_v31 = vrot.slane %v512_v29, 2 }
 0x21c   :  { %v507_v35 = vrot.slane %v506_v30, 1  ;;  %v514_v36 = vadd.f32 %v513_v31, %v512_v29 }
 0x21e   :  { %v515_v38 = vrot.slane %v514_v36, 1  ;;  %v508_v39 = vadd.f32 %v507_v35, %v506_v30 }
 0x220   :  { %v516_v42 = vadd.f32 %v515_v38, %v514_v36  ;;  %v527_v43 = vadd.f32 %v526_v41, %v508_v39 }
 0x222   :  { %v528_v44 = vadd.f32 %v526_v41, %v516_v42 }
 0x224   :  { %v531_v55 = vcombine.low %v527_v43, %v528_v44 }
 0x226   :  { %v538_v53 = vrot.slane %v531_v55, %v537_v45 }
 0x228   :  { %v545_v56 = vrot.slane %v538_v53, %v537_v45 }
 0x22a   :  { %551 = vst.msk [vmem:[#allocation3] sm:$0x3] %vm549_vm3, %v545_v56 }
 0x22b   :  { %666 = shalt.err (!%p663_p4)
}
 0x22c   :  { %561 = dma.vmem_to_hbm [thread:$0]  %s559_s21, 32, %s876_s7, [#allocation4]  }
 0x22d   :  { %675 = dma.done.wait [#allocation4], 32  }
 0x22e   :  { %676 = vsyncadd [#allocation4], 4294967264 }
 0x22f   :  { %565 = vsyncpa [#allocation4], 1 }

</bundles_post_ra>
